<compile_context>
chip_gen: v5e
topology: v5e:2x2
jax: 0.10.0
libtpu: 0.0.40
codegen_flags: <defaults>
</compile_context>

<pallas_src>
import functools
import math

import jax
import jax.numpy as jnp
from jax.experimental import pallas as pl
from jax.experimental.pallas import tpu as pltpu


def _round_up(x, m):
    return ((x + m - 1) // m) * m


@functools.lru_cache(maxsize=1)
def _hw_config():
    """Per-generation tile / VMEM defaults (v7x: 64 MiB VMEM; v5e/v6e: 128 MiB)."""
    vmem_phys = 0
    try:
        info = pltpu.get_tpu_info()
        vmem_phys = int(getattr(info, "vmem_capacity_bytes", 0) or 0)
    except Exception:
        vmem_phys = 0
    if vmem_phys >= 100 * 1024 * 1024:   # v5e / v6e class (128 MiB physical)
        return {"vmem_limit": 96 * 1024 * 1024, "tile_q": 256, "tile_k": 512, "tile_m": 512}
    if vmem_phys > 0:                    # v7x class (64 MiB physical)
        return {"vmem_limit": 48 * 1024 * 1024, "tile_q": 64, "tile_k": 512, "tile_m": 512}
    # Unknown generation -> conservative settings that fit everywhere.
    return {"vmem_limit": 48 * 1024 * 1024, "tile_q": 128, "tile_k": 512, "tile_m": 512}


# --------------------------- Linear: y = x @ W + b ---------------------------

def _linear_kernel(x_ref, w_ref, b_ref, o_ref):
    # Native-dtype operands feed the MXU; only the accumulation is f32.
    acc = jnp.dot(x_ref[...], w_ref[...], preferred_element_type=jnp.float32)
    o_ref[...] = (acc + b_ref[...].astype(jnp.float32)).astype(o_ref.dtype)


def linear(x, w, b=None):
    """x: (M, K), w: (K, N), b: (N,) or None -> (M, N)."""
    M, K = x.shape
    N = w.shape[1]
    cfg = _hw_config()
    itemsize = jnp.dtype(x.dtype).itemsize

    tm = min(_round_up(cfg["tile_m"], 8), _round_up(M, 8))
    budget = int(cfg["vmem_limit"] * 0.6)
    # TODO(synk): tile N (and K with an f32 accumulator scratch) instead of keeping the
    # whole (K, N) weight resident once K*N itself no longer fits the VMEM budget.
    while tm > 8 and (2 * tm * (K + N) * itemsize + 2 * (K + 1) * N * itemsize) > budget:
        tm = _round_up(max(8, tm // 2), 8)

    b2 = (b if b is not None else jnp.zeros((N,), x.dtype)).reshape(1, N)

    return pl.pallas_call(
        _linear_kernel,
        out_shape=jax.ShapeDtypeStruct((M, N), x.dtype),
        grid_spec=pltpu.PrefetchScalarGridSpec(
            num_scalar_prefetch=0,
            grid=(pl.cdiv(M, tm),),              # ragged last row-tile handled by Pallas
            in_specs=[
                pl.BlockSpec((tm, K), lambda i: (i, 0)),   # activation row tile (streamed)
                pl.BlockSpec((K, N), lambda i: (0, 0)),    # weight (resident)
                pl.BlockSpec((1, N), lambda i: (0, 0)),    # bias (resident)
            ],
            out_specs=pl.BlockSpec((tm, N), lambda i: (i, 0)),
        ),
        compiler_params=pltpu.CompilerParams(
            dimension_semantics=("parallel",),
            vmem_limit_bytes=cfg["vmem_limit"]),
    )(x, w, b2)


# ------------- Fused per-head score -> softmax(dim=0) -> weighted sum -------------

def _attn_core_kernel(q_ref, k_ref, score_ref, out_ref, acc_ref, *,
                      scale, n_head, hidden, k_len, block_k):
    ki = pl.program_id(1)

    @pl.when(ki == 0)
    def _init():
        acc_ref[...] = jnp.zeros_like(acc_ref)

    q = q_ref[...]                     # (mb, tq, n_head*hidden), native dtype
    k = k_ref[...]                     # (mb, tk, n_head*hidden), native dtype
    nhH = n_head * hidden

    if scale != 1.0:
        q = q * scale                  # fold softmax scale into q (tq*H, not tq*k_len mults)

    # Mask out-of-range rows of a ragged last k tile (emitted only when needed).
    if k_len % block_k != 0:
        kpos = ki * block_k + jax.lax.broadcasted_iota(jnp.int32, (1, block_k, 1), 1)
        k = jnp.where(kpos < k_len, k, jnp.zeros_like(k))

    aligned = (n_head == 1) or (hidden % 128 == 0)
    if aligned:
        # Head slices are lane-tile aligned (or trivial): use the narrow per-head matmuls.
        q_heads = [q[:, :, h * hidden:(h + 1) * hidden] for h in range(n_head)]
        k_heads = [k[:, :, h * hidden:(h + 1) * hidden] for h in range(n_head)]
        s_list = [jnp.einsum('bqd,bkd->bqk', q_heads[h], k_heads[h],
                             preferred_element_type=jnp.float32)
                  for h in range(n_head)]
    else:
        # Unaligned head width: select head features with lane masks (no cross-lane data
        # movement); full-width contraction is free while n_head*hidden stays MXU-sized.
        lane = jax.lax.broadcasted_iota(jnp.int32, (1, 1, nhH), 2)
        head_mask = [(lane >= h * hidden) & (lane < (h + 1) * hidden)
                     for h in range(n_head)]
        zq = jnp.zeros_like(q)
        s_list = [jnp.einsum('bqd,bkd->bqk', jnp.where(head_mask[h], q, zq), k,
                             preferred_element_type=jnp.float32)
                  for h in range(n_head)]

    # softmax over dim 0 of the (n_head*mb, q, k) score, i.e. across every head AND batch.
    # It does not reduce over k, so no online-softmax state is needed across k tiles.
    m = s_list[0].max(axis=0, keepdims=True)
    for s_h in s_list[1:]:
        m = jnp.maximum(m, s_h.max(axis=0, keepdims=True))
    e_list = [jnp.exp(s_h - m) for s_h in s_list]
    denom = e_list[0].sum(axis=0, keepdims=True)
    for e_h in e_list[1:]:
        denom = denom + e_h.sum(axis=0, keepdims=True)
    inv = pl.reciprocal(denom, approx=True)      # EUP slot, keeps VALU free
    p_list = [e_h * inv for e_h in e_list]

    # score tile in torch's (n_head*mb, tq, tk) head-major layout (concat along a major dim).
    score_ref[...] = jnp.concatenate(p_list, axis=0).astype(score_ref.dtype)

    # This k-tile's `out` contribution, already head-concatenated -> lane-dense (mb,tq,nhH).
    if aligned:
        step = jnp.concatenate(
            [jnp.einsum('bqk,bkd->bqd', p_list[h].astype(k.dtype), k_heads[h],
                        preferred_element_type=jnp.float32)
             for h in range(n_head)], axis=-1)
    else:
        step = None
        for h in range(n_head):
            contrib = jnp.einsum('bqk,bkn->bqn', p_list[h].astype(k.dtype), k,
                                 preferred_element_type=jnp.float32)
            contrib = jnp.where(head_mask[h], contrib, 0.0)
            step = contrib if step is None else step + contrib
    acc_ref[...] += step

    @pl.when(ki == pl.num_programs(1) - 1)
    def _finalize():
        out_ref[...] = acc_ref[...].astype(out_ref.dtype)


def _choose_attn_tiles(B, mb, nhH, q_len, k_len, itemsize, cfg):
    tq = min(_round_up(cfg["tile_q"], 8), _round_up(q_len, 8))
    # score's last block dim must be a multiple of 128 or the full k_len.
    tk = k_len if k_len <= cfg["tile_k"] else cfg["tile_k"]
    budget = int(cfg["vmem_limit"] * 0.6)

    def est(tq_, tk_):
        score_blk = B * tq_ * tk_
        stream = mb * (tq_ + tk_) * nhH
        out_blk = mb * tq_ * nhH
        # 2x pipeline buffers on streamed blocks, ~3 f32 softmax temporaries of
        # score-block size, plus the f32 accumulator scratch.
        return (2 * score_blk * itemsize + 3 * score_blk * 4
                + 2 * stream * itemsize + 2 * out_blk * itemsize + out_blk * 4)

    while est(tq, tk) > budget:
        if tq > 8:
            tq = _round_up(max(8, tq // 2), 8)
        elif tk > 128:
            tk = _round_up(max(128, tk // 2), 128)
        else:
            break
    return tq, tk


def attn_core(qx, kx, scale, *, n_head, hidden, score_dtype=None):
    """qx: (mb, q_len, n_head*hidden), kx: (mb, k_len, n_head*hidden)
       -> score (n_head*mb, q_len, k_len), out (mb, q_len, n_head*hidden)."""
    mb, q_len, nhH = qx.shape
    k_len = kx.shape[1]
    B = n_head * mb
    cfg = _hw_config()
    itemsize = jnp.dtype(qx.dtype).itemsize
    tq, tk = _choose_attn_tiles(B, mb, nhH, q_len, k_len, itemsize, cfg)
    if score_dtype is None:
        # TODO(synk): emit bf16 score when the caller tolerates it -- the score writeback
        # is the dominant HBM stream for long k_len.
        score_dtype = qx.dtype

    kernel = functools.partial(
        _attn_core_kernel, scale=float(scale), n_head=n_head, hidden=hidden,
        k_len=k_len, block_k=tk)

    score, out = pl.pallas_call(
        kernel,
        out_shape=(jax.ShapeDtypeStruct((B, q_len, k_len), score_dtype),
                   jax.ShapeDtypeStruct((mb, q_len, nhH), qx.dtype)),
        grid_spec=pltpu.PrefetchScalarGridSpec(
            num_scalar_prefetch=0,
            grid=(pl.cdiv(q_len, tq), pl.cdiv(k_len, tk)),
            in_specs=[
                pl.BlockSpec((mb, tq, nhH), lambda qi, ki: (0, qi, 0)),   # q tile
                pl.BlockSpec((mb, tk, nhH), lambda qi, ki: (0, ki, 0)),   # k tile (streamed)
            ],
            out_specs=[
                pl.BlockSpec((B, tq, tk), lambda qi, ki: (0, qi, ki)),    # score tile
                pl.BlockSpec((mb, tq, nhH), lambda qi, ki: (0, qi, 0)),   # out (resident over k)
            ],
            scratch_shapes=[pltpu.VMEM((mb, tq, nhH), jnp.float32)],      # f32 out accumulator
        ),
        compiler_params=pltpu.CompilerParams(
            dimension_semantics=("parallel", "arbitrary"),
            vmem_limit_bytes=cfg["vmem_limit"]),
    )(qx, kx)
    return score, out


# ------------------------------ Attention module ------------------------------

class Attention:
    def __init__(self, embed_dim, hidden_dim=None, out_dim=None, n_head=1,
                 score_function='dot_product', dropout=0.0, *, key):
        if hidden_dim is None:
            hidden_dim = embed_dim // n_head
        if out_dim is None:
            out_dim = embed_dim
        self.embed_dim = embed_dim
        self.hidden_dim = hidden_dim
        self.out_dim = out_dim
        self.n_head = n_head
        self.score_function = score_function
        self.dropout = dropout

        ks = jax.random.split(key, 7)

        def u(kk, shape, bound):
            return jax.random.uniform(kk, shape, jnp.float32, -bound, bound)

        lb = 1.0 / math.sqrt(embed_dim)
        self.w_k_w = u(ks[0], (embed_dim, n_head * hidden_dim), lb)
        self.w_k_b = u(ks[1], (n_head * hidden_dim,), lb)
        self.w_q_w = u(ks[2], (embed_dim, n_head * hidden_dim), lb)
        self.w_q_b = u(ks[3], (n_head * hidden_dim,), lb)
        pb = 1.0 / math.sqrt(n_head * hidden_dim)
        self.proj_w = u(ks[4], (n_head * hidden_dim, out_dim), pb)
        self.proj_b = u(ks[5], (out_dim,), pb)

        stdv = 1.0 / math.sqrt(hidden_dim)
        if score_function == 'bi_linear':
            self.weight = u(ks[6], (hidden_dim, hidden_dim), stdv)
        elif score_function == 'mlp':
            # TODO(synk): 'mlp' score_function (tanh(cat(kx, qx) @ w)) not ported to Pallas.
            self.weight = u(ks[6], (hidden_dim * 2,), stdv)
        else:
            self.weight = None

    def __call__(self, k, q):
        if q.ndim == 2:
            q = q[:, None, :]
        if k.ndim == 2:
            k = k[:, None, :]
        mb, k_len, _ = k.shape
        q_len = q.shape[1]
        nh, H = self.n_head, self.hidden_dim
        nhH = nh * H

        # The linears keep the (mb, len, n_head*hidden) layout -- no head transposes / HBM
        # copies anywhere; the attention kernel splits and merges heads in-register.
        kx = linear(k.reshape(mb * k_len, self.embed_dim), self.w_k_w, self.w_k_b)
        qx = linear(q.reshape(mb * q_len, self.embed_dim), self.w_q_w, self.w_q_b)
        kx = kx.reshape(mb, k_len, nhH)
        qx = qx.reshape(mb, q_len, nhH)

        if self.score_function == 'dot_product':
            scale = 1.0
        elif self.score_function == 'scaled_dot_product':
            scale = 1.0 / math.sqrt(H)
        elif self.score_function == 'bi_linear':
            # per-head right-multiplication by `weight`, via a free (.., nh, H) reshape
            qx = linear(qx.reshape(mb * q_len * nh, H), self.weight).reshape(mb, q_len, nhH)
            scale = 1.0
        else:
            # TODO(synk): 'mlp' score_function not implemented as a Pallas kernel.
            raise NotImplementedError("score_function 'mlp' not ported")

        score, out = attn_core(qx, kx, scale, n_head=nh, hidden=H)

        # `out` is already (mb, q_len, nh*H) with heads concatenated in-kernel.
        out = linear(out.reshape(mb * q_len, nhH), self.proj_w, self.proj_b)
        out = out.reshape(mb, q_len, self.out_dim)
        # TODO(synk): training-time nn.Dropout not applied (identity for p=0 / inference).
        return out, score


# ----------------------------- pure-JAX reference -----------------------------

def reference_forward(attn, k, q):
    if q.ndim == 2:
        q = q[:, None, :]
    if k.ndim == 2:
        k = k[:, None, :]
    mb, k_len, _ = k.shape
    q_len = q.shape[1]
    nh, H = attn.n_head, attn.hidden_dim
    hp = jax.lax.Precision.HIGHEST

    kx = jnp.einsum('ble,eh->blh', k, attn.w_k_w, precision=hp) + attn.w_k_b
    qx = jnp.einsum('ble,eh->blh', q, attn.w_q_w, precision=hp) + attn.w_q_b
    kx = kx.reshape(mb, k_len, nh, H).transpose(2, 0, 1, 3).reshape(nh * mb, k_len, H)
    qx = qx.reshape(mb, q_len, nh, H).transpose(2, 0, 1, 3).reshape(nh * mb, q_len, H)

    if attn.score_function == 'dot_product':
        score = jnp.einsum('bqd,bkd->bqk', qx, kx, precision=hp)
    elif attn.score_function == 'scaled_dot_product':
        score = jnp.einsum('bqd,bkd->bqk', qx, kx, precision=hp) / math.sqrt(H)
    elif attn.score_function == 'bi_linear':
        qw = jnp.einsum('bqd,de->bqe', qx, attn.weight, precision=hp)
        score = jnp.einsum('bqd,bkd->bqk', qw, kx, precision=hp)
    else:
        raise NotImplementedError
    score = jax.nn.softmax(score, axis=0)
    out = jnp.einsum('bqk,bkd->bqd', score, kx, precision=hp)
    out = out.reshape(nh, mb, q_len, H).transpose(1, 2, 0, 3).reshape(mb, q_len, nh * H)
    out = jnp.einsum('bqh,ho->bqo', out, attn.proj_w, precision=hp) + attn.proj_b
    return out, score


if __name__ == "__main__":
    key = jax.random.PRNGKey(0)
    k_params, k_kin, k_qin = jax.random.split(key, 3)

    batch, k_len, q_len, embed_dim, n_head = 2, 8, 8, 32, 2

    k_in = jax.random.normal(k_kin, (batch, k_len, embed_dim), jnp.float32)
    q_in = jax.random.normal(k_qin, (batch, q_len, embed_dim), jnp.float32)

    for score_fn in ("dot_product", "scaled_dot_product", "bi_linear"):
        attn = Attention(embed_dim, n_head=n_head, score_function=score_fn,
                         dropout=0.0, key=k_params)
        out, score = attn(k_in, q_in)
        jax.block_until_ready((out, score))

        out_ref, score_ref = reference_forward(attn, k_in, q_in)
        assert out.shape == (batch, q_len, embed_dim)
        assert score.shape == (n_head * batch, q_len, k_len)
        # tolerance widened slightly for the approx reciprocal / MXU accumulation order
        assert jnp.allclose(out, out_ref, rtol=5e-3, atol=5e-3), score_fn
        assert jnp.allclose(score, score_ref, rtol=5e-3, atol=5e-3), score_fn

    print("KERNEL_OK")
</pallas_src>

<mosaic_0001>
module attributes {stable_mosaic.version = 11 : i64} {
  func.func @_linear_kernel(%arg0: i32, %arg1: memref<16x32xf32, #tpu.memory_space<vmem>>, %arg2: memref<32x32xf32, #tpu.memory_space<vmem>>, %arg3: memref<1x32xf32, #tpu.memory_space<vmem>>, %arg4: memref<16x32xf32, #tpu.memory_space<vmem>>) attributes {dimension_semantics = [#tpu.dimension_semantics<parallel>], iteration_bounds = array<i64: 1>, scalar_prefetch = 0 : i64, scratch_operands = 0 : i64, tpu.core_type = #tpu.core_type<tc>, window_params = [{transform_indices = @transform_0, window_bounds = array<i64: 16, 32>}, {pipeline_mode = #tpu.pipeline_mode<synchronous>, transform_indices = @transform_1, window_bounds = array<i64: 32, 32>}, {pipeline_mode = #tpu.pipeline_mode<synchronous>, transform_indices = @transform_2, window_bounds = array<i64: 1, 32>}, {transform_indices = @transform_3, window_bounds = array<i64: 16, 32>}]} {
    %c0 = arith.constant 0 : index
    %c0_0 = arith.constant 0 : index
    %0 = vector.load %arg1[%c0, %c0_0] : memref<16x32xf32, #tpu.memory_space<vmem>>, vector<16x32xf32>
    %c0_1 = arith.constant 0 : index
    %c0_2 = arith.constant 0 : index
    %1 = vector.load %arg2[%c0_1, %c0_2] : memref<32x32xf32, #tpu.memory_space<vmem>>, vector<32x32xf32>
    %cst = arith.constant dense<0.000000e+00> : vector<16x32xf32>
    %2 = tpu.matmul %0, %1, %cst {dimension_numbers = #tpu.dot_dimension_numbers<[1], [0], [0], [1], [0, 0, 1, 1], [], []>} : vector<16x32xf32>, vector<32x32xf32>, vector<16x32xf32> -> vector<16x32xf32>
    %c0_3 = arith.constant 0 : index
    %c0_4 = arith.constant 0 : index
    %3 = vector.load %arg3[%c0_3, %c0_4] : memref<1x32xf32, #tpu.memory_space<vmem>>, vector<1x32xf32>
    %4 = vector.broadcast %3 : vector<1x32xf32> to vector<16x32xf32>
    %5 = arith.addf %2, %4 : vector<16x32xf32>
    %c0_5 = arith.constant 0 : index
    %c0_6 = arith.constant 0 : index
    %6 = vector.load %arg4[%c0_5, %c0_6] : memref<16x32xf32, #tpu.memory_space<vmem>>, vector<16x32xf32>
    tpu.vector_store %arg4[%c0_5, %c0_6], %5 {strides = array<i32>} : memref<16x32xf32, #tpu.memory_space<vmem>>, vector<16x32xf32>,
    return
  }
  func.func @transform_0(%arg0: i32) -> (i32, i32) {
    %c0_i32 = arith.constant 0 : i32
    %c0_i32_0 = arith.constant 0 : i32
    return %arg0, %c0_i32 : i32, i32
  }
  func.func @transform_1(%arg0: i32) -> (i32, i32) {
    %c0_i32 = arith.constant 0 : i32
    %c0_i32_0 = arith.constant 0 : i32
    %c0_i32_1 = arith.constant 0 : i32
    return %c0_i32, %c0_i32_0 : i32, i32
  }
  func.func @transform_2(%arg0: i32) -> (i32, i32) {
    %c0_i32 = arith.constant 0 : i32
    %c0_i32_0 = arith.constant 0 : i32
    %c0_i32_1 = arith.constant 0 : i32
    return %c0_i32, %c0_i32_0 : i32, i32
  }
  func.func @transform_3(%arg0: i32) -> (i32, i32) {
    %c0_i32 = arith.constant 0 : i32
    %c0_i32_0 = arith.constant 0 : i32
    return %arg0, %c0_i32 : i32, i32
  }
}

</mosaic_0001>

<bundles_post_ra>
// kernel: tpu_custom_call.1
= control target key start
LH: loop header
LB: loop body
LE: loop exit
PB: predicated region body
PF: predicated region fallthrough
CT: control target
= control target key end

     0   :  { %8 = vsyncpa [#allocation3], 0  ;;  %s249_s0 = inlined_call_operand.hbm [shape: f32[16,32], index: 0, kind: input, shape index: {}]   ;;  %s250_s1 = inlined_call_operand.hbm [shape: f32[32,32], index: 1, kind: input, shape index: {}]   ;;  %s251_s2 = inlined_call_operand.vmem [shape: f32[1,32], index: 2, kind: input, shape index: {}]   ;;  %s252_s3 = inlined_call_operand.hbm [shape: f32[16,32], index: 3, kind: output, shape index: {}]  }
   0x1   :  { %9 = vsyncpa [#allocation6], 0 }
   0x2   :  { %10 = vsyncpa [#allocation4], 0  ;;  %s15_s14 = sshll.u32 %s249_s0, 4  ;;  %s199_s15 = smov [#allocation2]   ;;  %s16_s14 = int_to_ptr.hbm [resolvable:$true] %s15_s14 }
   0x3   :  { %s17_s16 = sshll.u32 %s199_s15, 4  ;;  %s28_s19 = sshll.u32 %s250_s1, 4  ;;  %s18_s16 = int_to_ptr.vmem [resolvable:$true] %s17_s16  ;;  %s29_s19 = int_to_ptr.hbm [resolvable:$true] %s28_s19 }
   0x4   :  { %s200_s20 = smov 128   ;;  %s201_s21 = smov 8  }
   0x5   :  { %23 = dma.hbm_to_vmem [thread:$0]  %s16_s14, 256, %s18_s16, [#allocation3], %s200_s20, %s200_s20, %s201_s21  }
   0x6   :  { %s202_s22 = smov [#allocation5]  }
   0x7   :  { %s30_s23 = sshll.u32 %s202_s22, 4  ;;  %s31_s23 = int_to_ptr.vmem [resolvable:$true] %s30_s23 }
   0x8   :  { %36 = dma.hbm_to_vmem [thread:$0]  %s29_s19, 512, %s31_s23, [#allocation6], %s200_s20, %s200_s20, %s201_s21  }
   0x9   :  { %193 = dma.done.wait [#allocation3], 256  }
   0xa   :  { %194 = vsyncadd [#allocation3], 4294967040 }
   0xb   :  { %195 = dma.done.wait [#allocation6], 512  }
   0xc   :  { %196 = vsyncadd [#allocation6], 4294966784  ;;  %v52_v0 = vld [vmem:[#allocation5 + $0x18] sm:$0xff]  ;;  %v51_v1 = vld [vmem:[#allocation5 + $0x10] sm:$0xff]  ;;  %vm57_vm0 = vcmask 261120   ;;  %s203_s24 = smov [#allocation7]  }
   0xd   :  { %76 = vmatpush.msra.mxu0 %v52_v0  ;;  %111 = vmatpush.msra.mxu1 %v52_v0  ;;  %v50_v2 = vld [vmem:[#allocation5 + $0x8] sm:$0xff]  ;;  %v49_v3 = vld [vmem:[#allocation5] sm:$0xff]  ;;  %v47_v4 = vld [vmem:[#allocation2] sm:$0xff]  ;;  %s93_s25 = sshll.u32 %s203_s24, 4  ;;  %s95_s28 = sshll.u32 %s252_s3, 4  ;;  %s94_s25 = int_to_ptr.vmem [resolvable:$true] %s93_s25  ;;  %s96_s28 = int_to_ptr.hbm [resolvable:$true] %s95_s28 }
   0xe   :  { %v48_v5 = vld [vmem:[#allocation2 + $0x8] sm:$0xff]  ;;  %v120_v6 = vld [vmem:[%s251_s2] ss:$0 sm:$0xff] }
   0xf   :  { %77 = vmatpush.msra.mxu0 %v51_v1  ;;  %112 = vmatpush.msra.mxu1 %v51_v1 }
  0x11   :  { %78 = vmatpush.msra.mxu0 %v50_v2  ;;  %113 = vmatpush.msra.mxu1 %v50_v2 }
  0x13   :  { %79 = vmatpush.msra.mxu0 %v49_v3  ;;  %114 = vmatpush.msra.mxu1 %v49_v3 }
  0x14   :  { %109 = vmatmul.msk.f32.vlgmr.msra.gmra.mxu0 %vm57_vm0, %v47_v4  ;;  %110 = vmatmul.msk.f32.vlgmr.msra.gmra.mxu1 %vm57_vm0, %v48_v5 }
  0x91   :  { %v81_v7 = vpop.f32.mrf.mxu0  ;;  %v84_v8 = vpop.f32.mrf.mxu1 }
  0x92   :  { %v82_v9 = vadd.f32 %v120_v6, %v81_v7  ;;  %v85_v10 = vadd.f32 %v120_v6, %v84_v8 }
  0x94   :  { %87 = vst.msk [vmem:[#allocation7] sm:$0xff] %vm57_vm0, %v82_v9 }
  0x95   :  { %88 = vst.msk [vmem:[#allocation7 + $0x8] sm:$0xff] %vm57_vm0, %v85_v10 }
  0x96   :  { %101 = dma.vmem_to_hbm [thread:$0]  %s94_s25, 256, %s96_s28, [#allocation4], %s200_s20, %s200_s20, %s201_s21  }
  0x97   :  { %197 = dma.done.wait [#allocation4], 256  }
  0x98   :  { %198 = vsyncadd [#allocation4], 4294967040 }
  0x99   :  { %106 = vsyncpa [#allocation3], 1 }
  0x9a   :  { %107 = vsyncpa [#allocation6], 1 }
  0x9b   :  { %108 = vsyncpa [#allocation4], 1 }

</bundles_post_ra>
